<compile_context>
chip_gen: v7x
topology: tpu7x:2x2x1
jax: 0.10.0
libtpu: 0.0.40
codegen_flags: <defaults>
</compile_context>

<pallas_src>
import functools

import jax
import jax.numpy as jnp
import numpy as np
from jax import lax
from jax.experimental import pallas as pl
from jax.experimental.pallas import tpu as pltpu


def _down_kernel(x_ref, w1_ref, w2_ref, b1_ref, b2_ref, out_ref,
                 *, Hp, Wp, Cin, Cout, strip):
    """One (batch, row-strip) step of MaxPool2d(2) -> (conv3x3+BN+ReLU) x 2.

    x_ref : (1, Hp+4, 4, Wp*Cin) bf16  pooled-window layout, 2-row zero halo
    w1_ref: (3*Wp*Cin,  Wp*Cout) bf16  banded conv1 weights (BN1 scale folded)
    w2_ref: (3*Wp*Cout, Wp*Cout) bf16  banded conv2 weights (BN2 scale folded)
    b1_ref/b2_ref: (1, Wp*Cout) f32    BN shifts tiled per W position
    out_ref: (1, strip, Wp*Cout)       one output row-strip (lane dense)
    """
    WC_out = Wp * Cout
    i = pl.program_id(1)
    row0 = i * strip                      # strip start (padded-H coordinates)
    if strip % 8 == 0:
        row0 = pl.multiple_of(row0, 8)

    # ---- MaxPool2d(2): pool only the strip+4 rows this strip needs.  The
    # pool window is pre-arranged on axis 2, so the pool is one axis reduce
    # and the result is already lane-folded (lane = wp*Cin + ci). ----
    xw = x_ref[0, pl.ds(row0, strip + 4)]            # (strip+4, 4, Wp*Cin) bf16
    p = jnp.max(xw, axis=1)                          # (strip+4, Wp*Cin)    bf16

    # ---- Conv1 (3x3, pad=1; BN1 scale pre-folded): single deep-K MXU dot ----
    r1 = strip + 2                        # strip rows + 1-row halo each side
    lhs1 = jnp.concatenate([p[0:r1], p[1:r1 + 1], p[2:r1 + 2]], axis=1)
    acc1 = jnp.dot(lhs1, w1_ref[...], preferred_element_type=jnp.float32)
    y1 = jnp.maximum(acc1 + b1_ref[...], 0.0)        # f32 epilogue
    # Rows outside the image act as conv2's zero padding -> force exact zeros
    # (cheap (r1,1) predicate, broadcast by the where).
    r_log = row0 - 1 + lax.broadcasted_iota(jnp.int32, (r1, 1), 0)
    y1 = jnp.where((r_log >= 0) & (r_log < Hp), y1, 0.0)
    y1b = y1.astype(jnp.bfloat16)

    # ---- Conv2 (3x3, pad=1; BN2 scale pre-folded): single deep-K MXU dot ----
    lhs2 = jnp.concatenate(
        [y1b[0:strip], y1b[1:strip + 1], y1b[2:strip + 2]], axis=1)
    acc2 = jnp.dot(lhs2, w2_ref[...], preferred_element_type=jnp.float32)
    y2 = jnp.maximum(acc2 + b2_ref[...], 0.0)

    out_ref[0] = y2.astype(out_ref.dtype)            # lane-dense store


def _band_weights(w_hwio, scale, Wp):
    """Banded, fused-dy conv weights with BN scale folded in.

    Returns B of shape (3*Wp*Ci, Wp*Co), bf16, with
      B[dy*Wp*Ci + w_in*Ci + ci, w_out*Co + co] = scale[co] * w[dy, dx, ci, co]
    where dx = w_in - w_out + 1 and taps with dx outside [0,3) are zero
    (this encodes the W-direction zero padding of the conv).
    """
    _, _, Ci, Co = w_hwio.shape
    sel = np.zeros((3, Wp, Wp), np.float32)
    for dx in range(3):
        for wo in range(Wp):
            wi = wo + dx - 1
            if 0 <= wi < Wp:
                sel[dx, wi, wo] = 1.0
    w_scaled = w_hwio.astype(jnp.float32) * scale[None, None, None, :]
    band = jnp.einsum('xab,yxio->yaibo', jnp.asarray(sel), w_scaled)
    return band.reshape(3 * Wp * Ci, Wp * Co).astype(jnp.bfloat16)


def _pick_strip(Hp):
    for s in (32, 16, 8):
        if Hp % s == 0:
            return s
    return Hp  # TODO(synk): huge odd Hp -> one big strip (vreg-pressure risk)


def down_forward(x_nchw, w1_oihw, w2_oihw, scale1, shift1, scale2, shift2):
    """Pallas implementation of down(in_ch, out_ch).forward (NCHW in/out)."""
    N, Cin, H, W = x_nchw.shape
    Cout = w1_oihw.shape[0]
    assert H % 2 == 0 and W % 2 == 0, "even H/W required (MaxPool2d(2))"
    Hp, Wp = H // 2, W // 2
    strip = _pick_strip(Hp)
    n_strips = Hp // strip

    # Layout plumbing (wrapper side).  Pool-window layout, bf16 cast fused
    # into the transpose, plus a 2-row zero halo along pooled-H (the conv's
    # zero padding), so the kernel never needs negative row indices:
    #   x_pool[n, hp+2, hk*2+wk, wp*Cin+c] = x[n, c, 2*hp+hk, 2*wp+wk]
    x_pool = jnp.transpose(
        x_nchw.reshape(N, Cin, Hp, 2, Wp, 2), (0, 2, 3, 5, 4, 1)
    ).reshape(N, Hp, 4, Wp * Cin).astype(jnp.bfloat16)
    x_pool = jnp.pad(x_pool, ((0, 0), (2, 2), (0, 0), (0, 0)))

    w1_hwio = jnp.transpose(w1_oihw, (2, 3, 1, 0))   # (3, 3, Cin, Cout)
    w2_hwio = jnp.transpose(w2_oihw, (2, 3, 1, 0))   # (3, 3, Cout, Cout)
    w1b = _band_weights(w1_hwio, scale1.astype(jnp.float32), Wp)
    w2b = _band_weights(w2_hwio, scale2.astype(jnp.float32), Wp)
    b1 = jnp.tile(shift1.astype(jnp.float32), Wp)[None, :]        # (1, Wp*Cout)
    b2 = jnp.tile(shift2.astype(jnp.float32), Wp)[None, :]

    kernel = functools.partial(_down_kernel, Hp=Hp, Wp=Wp, Cin=Cin,
                               Cout=Cout, strip=strip)

    out = pl.pallas_call(
        kernel,
        out_shape=jax.ShapeDtypeStruct((N, Hp, Wp * Cout), x_nchw.dtype),
        grid_spec=pltpu.PrefetchScalarGridSpec(
            num_scalar_prefetch=0,
            grid=(N, n_strips),
            in_specs=[
                pl.BlockSpec((1, Hp + 4, 4, Wp * Cin),
                             lambda n, i: (n, 0, 0, 0)),
                pl.BlockSpec((3 * Wp * Cin, Wp * Cout), lambda n, i: (0, 0)),
                pl.BlockSpec((3 * Wp * Cout, Wp * Cout), lambda n, i: (0, 0)),
                pl.BlockSpec((1, Wp * Cout), lambda n, i: (0, 0)),
                pl.BlockSpec((1, Wp * Cout), lambda n, i: (0, 0)),
            ],
            out_specs=pl.BlockSpec((1, strip, Wp * Cout),
                                   lambda n, i: (n, i, 0)),
        ),
        compiler_params=pltpu.CompilerParams(
            dimension_semantics=("parallel", "parallel"),
            vmem_limit_bytes=32 * 1024 * 1024),
    )(x_pool, w1b, w2b, b1, b2)

    # (N, Hp, Wp*Cout) -> NCHW
    return jnp.transpose(out.reshape(N, Hp, Wp, Cout), (0, 3, 1, 2))


def _ref_down(x, w1, w2, s1, b1, s2, b2):
    """Pure-JAX f32 reference (NCHW), mirrors the PyTorch module in eval mode."""
    p = lax.reduce_window(x, -jnp.inf, lax.max,
                          (1, 1, 2, 2), (1, 1, 2, 2), 'VALID')
    y = lax.conv_general_dilated(p, w1, (1, 1), 'SAME',
                                 dimension_numbers=('NCHW', 'OIHW', 'NCHW'))
    y = jnp.maximum(y * s1[None, :, None, None] + b1[None, :, None, None], 0.0)
    y = lax.conv_general_dilated(y, w2, (1, 1), 'SAME',
                                 dimension_numbers=('NCHW', 'OIHW', 'NCHW'))
    y = jnp.maximum(y * s2[None, :, None, None] + b2[None, :, None, None], 0.0)
    return y


if __name__ == "__main__":
    # H=W=32 so Wp*Cout = 16*8 = 128 (lane-dense output); Hp=16 -> strip=16.
    N, Cin, Cout, H, W = 2, 4, 8, 32, 32
    eps = 1e-5

    key = jax.random.PRNGKey(0)
    kx, k1, k2 = jax.random.split(key, 3)

    x = jax.random.normal(kx, (N, Cin, H, W), jnp.float32)

    # Conv weights (PyTorch OIHW layout), deterministic init.
    w1_oihw = 0.1 * jax.random.normal(k1, (Cout, Cin, 3, 3), jnp.float32)
    w2_oihw = 0.1 * jax.random.normal(k2, (Cout, Cout, 3, 3), jnp.float32)

    # BatchNorm parameters (deterministic, non-trivial), folded to scale/shift.
    def bn_fold(c, seed_off):
        idx = jnp.arange(c, dtype=jnp.float32)
        gamma = 1.0 + 0.1 * idx + 0.01 * seed_off
        beta = 0.02 * idx - 0.01 * seed_off
        running_mean = 0.05 * idx
        running_var = 1.0 + 0.05 * idx
        scale = gamma / jnp.sqrt(running_var + eps)
        shift = beta - running_mean * scale
        return scale, shift

    scale1, shift1 = bn_fold(Cout, 1.0)
    scale2, shift2 = bn_fold(Cout, 2.0)

    out = down_forward(x, w1_oihw, w2_oihw, scale1, shift1, scale2, shift2)
    out = jax.block_until_ready(out)

    ref = _ref_down(x, w1_oihw, w2_oihw, scale1, shift1, scale2, shift2)
    assert out.shape == (N, Cout, H // 2, W // 2), out.shape
    # bf16 MXU operands -> relaxed tolerance vs the f32 reference.
    assert jnp.allclose(out, ref, atol=5e-2, rtol=5e-2), (
        float(jnp.max(jnp.abs(out - ref))))

    print("KERNEL_OK")
</pallas_src>

<mosaic_0001>
module attributes {stable_mosaic.version = 11 : i64} {
  func.func @_down_kernel(%arg0: i32, %arg1: i32, %arg2: memref<1x20x4x64xbf16, #tpu.memory_space<vmem>>, %arg3: memref<192x128xbf16, #tpu.memory_space<vmem>>, %arg4: memref<384x128xbf16, #tpu.memory_space<vmem>>, %arg5: memref<1x128xf32, #tpu.memory_space<vmem>>, %arg6: memref<1x128xf32, #tpu.memory_space<vmem>>, %arg7: memref<1x16x128xf32, #tpu.memory_space<vmem>>) attributes {dimension_semantics = [#tpu.dimension_semantics<parallel>, #tpu.dimension_semantics<parallel>], iteration_bounds = array<i64: 2, 1>, scalar_prefetch = 0 : i64, scratch_operands = 0 : i64, tpu.core_type = #tpu.core_type<tc>, window_params = [{transform_indices = @transform_0, window_bounds = array<i64: 1, 20, 4, 64>}, {pipeline_mode = #tpu.pipeline_mode<synchronous>, transform_indices = @transform_1, window_bounds = array<i64: 192, 128>}, {pipeline_mode = #tpu.pipeline_mode<synchronous>, transform_indices = @transform_2, window_bounds = array<i64: 384, 128>}, {pipeline_mode = #tpu.pipeline_mode<synchronous>, transform_indices = @transform_3, window_bounds = array<i64: 1, 128>}, {pipeline_mode = #tpu.pipeline_mode<synchronous>, transform_indices = @transform_4, window_bounds = array<i64: 1, 128>}, {transform_indices = @transform_5, window_bounds = array<i64: 1, 16, 128>}]} {
    %c16_i32 = arith.constant 16 : i32
    %0 = arith.muli %arg1, %c16_i32 : i32
    %1 = tpu.assume_multiple %0, 8 : i32
    %c0 = arith.constant 0 : index
    %2 = arith.index_cast %1 : i32 to index
    %c0_0 = arith.constant 0 : index
    %c0_1 = arith.constant 0 : index
    %3 = vector.load %arg2[%c0, %2, %c0_0, %c0_1] : memref<1x20x4x64xbf16, #tpu.memory_space<vmem>>, vector<1x20x4x64xbf16>
    %4 = vector.shape_cast %3 : vector<1x20x4x64xbf16> to vector<20x4x64xbf16>
    %cst = arith.constant dense<0xFF80> : vector<20x64xbf16>
    %5 = vector.multi_reduction <maximumf>, %4, %cst [1] : vector<20x4x64xbf16> to vector<20x64xbf16>
    %6 = vector.extract_strided_slice %5 {offsets = [0, 0], sizes = [18, 64], strides = [1, 1]} : vector<20x64xbf16> to vector<18x64xbf16>
    %7 = vector.extract_strided_slice %5 {offsets = [1, 0], sizes = [18, 64], strides = [1, 1]} : vector<20x64xbf16> to vector<18x64xbf16>
    %8 = vector.extract_strided_slice %5 {offsets = [2, 0], sizes = [18, 64], strides = [1, 1]} : vector<20x64xbf16> to vector<18x64xbf16>
    %9 = tpu.concatenate %6, %7, %8 in 1 : vector<18x64xbf16>, vector<18x64xbf16>, vector<18x64xbf16> -> vector<18x192xbf16>
    %c0_2 = arith.constant 0 : index
    %c0_3 = arith.constant 0 : index
    %10 = vector.load %arg3[%c0_2, %c0_3] : memref<192x128xbf16, #tpu.memory_space<vmem>>, vector<192x128xbf16>
    %cst_4 = arith.constant dense<0.000000e+00> : vector<18x128xf32>
    %11 = tpu.matmul %9, %10, %cst_4 {dimension_numbers = #tpu.dot_dimension_numbers<[1], [0], [0], [1], [0, 0, 1, 1], [], []>} : vector<18x192xbf16>, vector<192x128xbf16>, vector<18x128xf32> -> vector<18x128xf32>
    %c0_5 = arith.constant 0 : index
    %c0_6 = arith.constant 0 : index
    %12 = vector.load %arg5[%c0_5, %c0_6] : memref<1x128xf32, #tpu.memory_space<vmem>>, vector<1x128xf32>
    %13 = vector.broadcast %12 : vector<1x128xf32> to vector<18x128xf32>
    %14 = arith.addf %11, %13 : vector<18x128xf32>
    %cst_7 = arith.constant 0.000000e+00 : f32
    %15 = vector.broadcast %cst_7 : f32 to vector<18x128xf32>
    %16 = arith.maximumf %14, %15 : vector<18x128xf32>
    %c1_i32 = arith.constant 1 : i32
    %17 = arith.subi %1, %c1_i32 : i32
    %18 = tpu.iota {dimensions = array<i32: 0>} : vector<18x1xi32>
    %19 = vector.broadcast %17 : i32 to vector<18x1xi32>
    %20 = arith.addi %19, %18 : vector<18x1xi32>
    %c0_i32 = arith.constant 0 : i32
    %21 = vector.broadcast %c0_i32 : i32 to vector<18x1xi32>
    %22 = arith.cmpi sge, %20, %21 : vector<18x1xi32>
    %c16_i32_8 = arith.constant 16 : i32
    %23 = vector.broadcast %c16_i32_8 : i32 to vector<18x1xi32>
    %24 = arith.cmpi slt, %20, %23 : vector<18x1xi32>
    %25 = arith.andi %22, %24 : vector<18x1xi1>
    %cst_9 = arith.constant 0.000000e+00 : f32
    %26 = vector.shape_cast %25 : vector<18x1xi1> to vector<18x1xi1>
    %27 = vector.broadcast %26 : vector<18x1xi1> to vector<18x128xi1>
    %28 = vector.broadcast %cst_9 : f32 to vector<18x128xf32>
    %29 = arith.select %27, %16, %28 : vector<18x128xi1>, vector<18x128xf32>
    %30 = arith.truncf %29 : vector<18x128xf32> to vector<18x128xbf16>
    %31 = vector.extract_strided_slice %30 {offsets = [0, 0], sizes = [16, 128], strides = [1, 1]} : vector<18x128xbf16> to vector<16x128xbf16>
    %32 = vector.extract_strided_slice %30 {offsets = [1, 0], sizes = [16, 128], strides = [1, 1]} : vector<18x128xbf16> to vector<16x128xbf16>
    %33 = vector.extract_strided_slice %30 {offsets = [2, 0], sizes = [16, 128], strides = [1, 1]} : vector<18x128xbf16> to vector<16x128xbf16>
    %34 = tpu.concatenate %31, %32, %33 in 1 : vector<16x128xbf16>, vector<16x128xbf16>, vector<16x128xbf16> -> vector<16x384xbf16>
    %c0_10 = arith.constant 0 : index
    %c0_11 = arith.constant 0 : index
    %35 = vector.load %arg4[%c0_10, %c0_11] : memref<384x128xbf16, #tpu.memory_space<vmem>>, vector<384x128xbf16>
    %cst_12 = arith.constant dense<0.000000e+00> : vector<16x128xf32>
    %36 = tpu.matmul %34, %35, %cst_12 {dimension_numbers = #tpu.dot_dimension_numbers<[1], [0], [0], [1], [0, 0, 1, 1], [], []>} : vector<16x384xbf16>, vector<384x128xbf16>, vector<16x128xf32> -> vector<16x128xf32>
    %c0_13 = arith.constant 0 : index
    %c0_14 = arith.constant 0 : index
    %37 = vector.load %arg6[%c0_13, %c0_14] : memref<1x128xf32, #tpu.memory_space<vmem>>, vector<1x128xf32>
    %38 = vector.broadcast %37 : vector<1x128xf32> to vector<16x128xf32>
    %39 = arith.addf %36, %38 : vector<16x128xf32>
    %cst_15 = arith.constant 0.000000e+00 : f32
    %40 = vector.broadcast %cst_15 : f32 to vector<16x128xf32>
    %41 = arith.maximumf %39, %40 : vector<16x128xf32>
    %c0_16 = arith.constant 0 : index
    %c0_17 = arith.constant 0 : index
    %c0_18 = arith.constant 0 : index
    %42 = vector.load %arg7[%c0_16, %c0_17, %c0_18] : memref<1x16x128xf32, #tpu.memory_space<vmem>>, vector<1x16x128xf32>
    %43 = vector.shape_cast %42 : vector<1x16x128xf32> to vector<16x128xf32>
    %44 = vector.shape_cast %41 : vector<16x128xf32> to vector<1x16x128xf32>
    tpu.vector_store %arg7[%c0_16, %c0_17, %c0_18], %44 {strides = array<i32>} : memref<1x16x128xf32, #tpu.memory_space<vmem>>, vector<1x16x128xf32>,
    return
  }
  func.func @transform_0(%arg0: i32, %arg1: i32) -> (i32, i32, i32, i32) {
    %c0_i32 = arith.constant 0 : i32
    %c0_i32_0 = arith.constant 0 : i32
    %c0_i32_1 = arith.constant 0 : i32
    %c0_i32_2 = arith.constant 0 : i32
    return %arg0, %c0_i32, %c0_i32_0, %c0_i32_1 : i32, i32, i32, i32
  }
  func.func @transform_1(%arg0: i32, %arg1: i32) -> (i32, i32) {
    %c0_i32 = arith.constant 0 : i32
    %c0_i32_0 = arith.constant 0 : i32
    %c0_i32_1 = arith.constant 0 : i32
    return %c0_i32, %c0_i32_0 : i32, i32
  }
  func.func @transform_2(%arg0: i32, %arg1: i32) -> (i32, i32) {
    %c0_i32 = arith.constant 0 : i32
    %c0_i32_0 = arith.constant 0 : i32
    %c0_i32_1 = arith.constant 0 : i32
    return %c0_i32, %c0_i32_0 : i32, i32
  }
  func.func @transform_3(%arg0: i32, %arg1: i32) -> (i32, i32) {
    %c0_i32 = arith.constant 0 : i32
    %c0_i32_0 = arith.constant 0 : i32
    %c0_i32_1 = arith.constant 0 : i32
    return %c0_i32, %c0_i32_0 : i32, i32
  }
  func.func @transform_4(%arg0: i32, %arg1: i32) -> (i32, i32) {
    %c0_i32 = arith.constant 0 : i32
    %c0_i32_0 = arith.constant 0 : i32
    %c0_i32_1 = arith.constant 0 : i32
    return %c0_i32, %c0_i32_0 : i32, i32
  }
  func.func @transform_5(%arg0: i32, %arg1: i32) -> (i32, i32, i32) {
    %c0_i32 = arith.constant 0 : i32
    %c0_i32_0 = arith.constant 0 : i32
    return %arg0, %arg1, %c0_i32 : i32, i32, i32
  }
}

</mosaic_0001>

<bundles_post_ra>
// kernel: tpu_custom_call.1
= control target key start
LH: loop header
LB: loop body
LE: loop exit
PB: predicated region body
PF: predicated region fallthrough
CT: control target
= control target key end

     0   :  { %10 = vsyncpa [#allocation3], 0  ;;  %s2250_s0 = inlined_call_operand.hbm [shape: bf16[2,20,4,64], index: 0, kind: input, shape index: {}]   ;;  %s2251_s1 = inlined_call_operand.hbm [shape: bf16[192,128], index: 1, kind: input, shape index: {}]   ;;  %s2252_s2 = inlined_call_operand.hbm [shape: bf16[384,128], index: 2, kind: input, shape index: {}]   ;;  %s2253_s3 = inlined_call_operand.vmem [shape: f32[1,128], index: 3, kind: input, shape index: {}]   ;;  %s2254_s4 = inlined_call_operand.vmem [shape: f32[1,128], index: 4, kind: input, shape index: {}]   ;;  %s2255_s5 = inlined_call_operand.hbm [shape: f32[2,16,128], index: 5, kind: output, shape index: {}]  }
   0x1   :  { %12 = vsyncpa [#allocation3 + $0x1], 0 }
   0x2   :  { %13 = vsyncpa [#allocation6], 0 }
   0x3   :  { %14 = vsyncpa [#allocation4], 0 }
   0x4   :  { %16 = vsyncpa [#allocation4 + $0x1], 0  ;;  %s1764_s18 = smov 0   ;;  %s1766_s19 = smov 0  }
   0x5   :  { %s1768_s20 = smov 0   ;;  %s1770_s21 = smov 0  }
   0x6   :  { %s1772_s22 = smov 0   ;;  %s1774_s23 = smov 0  }
   0x7 LB: > { %s1301_s24 = sadd.s32 4294967295, %s1717_s23   ;;  %s1302_s25 = sadd.s32 4294967294, %s1717_s23   ;;  %s1717_s23 = sphi %s1774_s23, %s22_s23   ;;  %s1713_s22 = sphi %s1772_s22, %s2277_s22   ;;  %s1709_s21 = sphi %s1770_s21, %s2276_s21   ;;  %s1705_s20 = sphi %s1768_s20, %s2275_s20   ;;  %s1701_s19 = sphi %s1766_s19, %s2274_s19   ;;  %s1697_s18 = sphi %s1764_s18, %s2273_s18  }
   0x8   : > { %p54_p0 = scmp.ne.s32.totalorder %s1701_s19, %s1697_s18  ;;  %p1798_p1 = scmp.eq.s32.totalorder %s1301_s24, 0 }
   0x9   : > { %p1802_p2 = scmp.eq.s32.totalorder %s1301_s24, 1  ;;  %p170_p3 = scmp.eq.s32.totalorder %s1302_s25, 1 }
   0xa   : > { %s2260_s26 = scalar_select %p1798_p1, 1, 0 }
   0xb   : > { %p1808_p4 = por %p1798_p1, %p54_p0  ;;  %p1303_p5 = scmp.ge.s32.totalorder %s1717_s23, 1 }
   0xc   : > { %p1813_p6 = por %p170_p3, %p54_p0  ;;  %p177_p7 = scmp.lt.s32.totalorder %s1717_s23, 3 }
   0xd   : > { %s2262_s28 = scalar_select %p1808_p4, 1, 0 }
   0xe   : > { %s2263_s29 = scalar_select %p1813_p6, 1, 0 }
   0xf   : > { %p1818_p8 = pnand %p1303_p5, %p177_p7  ;;  %s1719_s6 = smov [#allocation5]  }
  0x10   : > { %s189_s7 = sshll.u32 %s1719_s6, 4  ;;  %s1720_s9 = smov [#allocation7]   ;;  %s1822_s7 = int_to_ptr.vmem [resolvable:$true] %s189_s7 }
  0x11   : > { %p1427_p9 = pneg %p1818_p8  ;;  %s202_s10 = sshll.u32 %s1720_s9, 4  ;;  %s1833_s10 = int_to_ptr.vmem [resolvable:$true] %s202_s10 }
  0x12   : > { %s1545_s13 = scalar_lea.hbm %s2251_s1, 1536 }
  0x13   : > { %p1829_p11 = pnand %p1427_p9, %p1798_p1  ;;  %p1546_p12 = scmp.ne.s32.totalorder %s2251_s1, %s1545_s13 }
  0x14   : > { %p1552_p5 = scmp.lt.u32.totalorder %s1545_s13, %s2251_s1 }
  0x15   : > { %p1547_p13 = pneg %p1829_p11 }
  0x17   : > { %p1548_p0 = pnand %p1547_p13, %p1546_p12 }
  0x19   : > { %p1549_p3 = pneg %p1548_p0 }
  0x1b   : > { %p1554_p7 = pnand %p1552_p5, %p1549_p3 }
  0x1d   : > { %1557 = shalt.err (!%p1554_p7)
}
  0x1e   : > { %s1558_s24 = scalar_lea.vmem %s1822_s7, 1536  ;;  %p1566_p1 = scmp.lt.s32.totalorder %s1822_s7, %s1822_s7 }
  0x1f   : > { %p1559_p9 = scmp.ne.s32.totalorder %s1822_s7, %s1558_s24  ;;  %p1567_p12 = scmp.lt.s32.totalorder %s1558_s24, %s1558_s24 }
  0x21   : > { %p1561_p10 = pnand %p1559_p9, %p1547_p13  ;;  %p1568_p0 = por %p1567_p12, %p1566_p1 }
  0x23   : > { %p1562_p6 = pneg %p1561_p10 }
  0x25   : > { %p1569_p4 = pnand %p1568_p0, %p1562_p6 }
  0x27   : > { %1572 = shalt.err (!%p1569_p4)
}
  0x28   : > { %s1721_s25 = smov 64   ;;  %s1722_s6 = smov 4  }
  0x29   : > { %1430 = dma.hbm_to_vmem [thread:$0]  (!%p1829_p11), %s2251_s1, 1536, %s1822_s7, [#allocation6], %s1721_s25, %s1721_s25, %s1722_s6  }
  0x2a   : > { %s1573_s14 = scalar_lea.hbm %s2252_s2, 3072 }
  0x2b   : > { %p1574_p1 = scmp.ne.s32.totalorder %s2252_s2, %s1573_s14  ;;  %p1580_p10 = scmp.lt.u32.totalorder %s1573_s14, %s2252_s2 }
  0x2d   : > { %p1576_p4 = pnand %p1574_p1, %p1547_p13 }
  0x2f   : > { %p1577_p6 = pneg %p1576_p4 }
  0x31   : > { %p1582_p3 = pnand %p1580_p10, %p1577_p6 }
  0x33   : > { %1585 = shalt.err (!%p1582_p3)
}
  0x34   : > { %s1586_s7 = scalar_lea.vmem %s1833_s10, 3072  ;;  %p1594_p12 = scmp.lt.s32.totalorder %s1833_s10, %s1833_s10 }
  0x35   : > { %p1587_p5 = scmp.ne.s32.totalorder %s1833_s10, %s1586_s7  ;;  %p1595_p0 = scmp.lt.s32.totalorder %s1586_s7, %s1586_s7 }
  0x37   : > { %p1589_p7 = pnand %p1587_p5, %p1547_p13  ;;  %p1596_p1 = por %p1595_p0, %p1594_p12 }
  0x39   : > { %p1590_p9 = pneg %p1589_p7 }
  0x3b   : > { %p1597_p4 = pnand %p1596_p1, %p1590_p9 }
  0x3d   : > { %1600 = shalt.err (!%p1597_p4)
}
  0x3e   : > { %1433 = dma.hbm_to_vmem [thread:$0]  (!%p1829_p11), %s2252_s2, 3072, %s1833_s10, [#allocation6], %s1721_s25, %s1721_s25, %s1722_s6  }
  0x3f   : > { %s34_s12 = sadd.s32 1, %s1713_s22  ;;  %s41_s13 = sadd.s32 1, %s1705_s20 }
  0x40   : > { %p36_p13 = scmp.ge.s32.totalorder %s34_s12, 2  ;;  %p48_p6 = scmp.ne.s32.totalorder %s1705_s20, %s1701_s19 }
  0x41   : > { %p49_p10 = scmp.eq.s32.totalorder %s1717_s23, 0  ;;  %p1444_p3 = scmp.lt.s32.totalorder %s1717_s23, 2 }
  0x42   : > { %s2279_s12 = smov (%p36_p13, %s34_s12), 0  ;;  %p1897_p7 = por %p1802_p2, %p48_p6 }
  0x43   : > { %p50_p5 = por %p49_p10, %p48_p6  ;;  %s38_s14 = ssub.s32 %s1713_s22, %s2279_s12 }
  0x44   : > { %s2266_s8 = scalar_select %p1897_p7, 1, 0 }
  0x45   : > { %s222_s15 = sand.u32 1, %s1705_s20   ;;  %p39_p9 = scmp.eq.s32.totalorder %s38_s14, 0 }
  0x46   : > { %s1412_s10 = smul.u32 40, %s222_s15  ;;  %p1904_p11 = pnand %p1444_p3, %p50_p5 }
  0x47   : > { %s1909_s6 = scalar_select %p39_p9, %s1705_s20, %s41_s13  }
  0x48   : > { %s1413_s16 = smul.u32 640, %s1713_s22  ;;  %s226_s17 = scalar_lea.vmem [#allocation2], %s1412_s10 }
  0x49   : > { %s233_s24 = sshll.u32 %s226_s17, 4  ;;  %s1919_s11 = scalar_lea.sflag [#allocation3], %s222_s15  ;;  %s1917_s24 = int_to_ptr.vmem [resolvable:$true] %s233_s24 }
  0x4a   : > { %s1915_s9 = scalar_lea.hbm %s2250_s0, %s1413_s16  ;;  %p1603_p12 = pneg %p1904_p11 }
  0x4b   : > { %s1601_s14 = scalar_lea.hbm %s1915_s9, 640  ;;  %s1606_s16 = scalar_lea.hbm %s2250_s0, 1280 }
  0x4c   : > { %p1602_p2 = scmp.ne.s32.totalorder %s1915_s9, %s1601_s14  ;;  %p1607_p4 = scmp.lt.u32.totalorder %s1915_s9, %s2250_s0 }
  0x4d   : > { %p1608_p13 = scmp.lt.u32.totalorder %s1606_s16, %s1601_s14  ;;  %p1610_p10 = scmp.lt.u32.totalorder %s1601_s14, %s1915_s9 }
  0x4e   : > { %p1604_p0 = pnand %p1603_p12, %p1602_p2 }
  0x4f   : > { %p1609_p6 = por %p1608_p13, %p1607_p4 }
  0x50   : > { %p1605_p1 = pneg %p1604_p0 }
  0x51   : > { %p1611_p3 = por %p1610_p10, %p1609_p6 }
  0x53   : > { %p1612_p5 = pnand %p1611_p3, %p1605_p1 }
  0x55   : > { %1615 = shalt.err (!%p1612_p5)
}
  0x56   : > { %s1616_s15 = scalar_lea.vmem %s1917_s24, 640  ;;  %s1723_s7 = smov [#allocation2]  }
  0x57   : > { %p1617_p9 = scmp.ne.s32.totalorder %s1917_s24, %s1616_s15  ;;  %s1621_s13 = sshll.u32 %s1723_s7, 4  ;;  %s1622_s13 = int_to_ptr.vmem [resolvable:$false] %s1621_s13 }
  0x58   : > { %s1623_s10 = scalar_lea.vmem %s1622_s13, 1280  ;;  %p1624_p7 = scmp.lt.s32.totalorder %s1917_s24, %s1622_s13 }
  0x59   : > { %p1619_p2 = pnand %p1617_p9, %p1603_p12  ;;  %p1625_p4 = scmp.lt.s32.totalorder %s1623_s10, %s1616_s15 }
  0x5b   : > { %p1620_p0 = pneg %p1619_p2  ;;  %p1626_p13 = por %p1625_p4, %p1624_p7 }
  0x5d   : > { %p1627_p6 = pnand %p1626_p13, %p1620_p0 }
  0x5f   : > { %1630 = shalt.err (!%p1627_p6)
}
  0x60   : > { %s1724_s14 = smov 32   ;;  %s1725_s16 = smov 2  }
  0x61   : > { %1437 = dma.hbm_to_vmem [thread:$0]  (!%p1904_p11), %s1915_s9, 640, %s1917_s24, %s1919_s11, %s1724_s14, %s1724_s14, %s1725_s16  }
  0x62   : > { %245 = sbr.rel (%p1818_p8) target bundleno = 795 (0x31b), region = 40  ;;  %s1950_s17 = sand.u32 (!%p1818_p8), 1, %s1701_s19  }
  0x63   : > { %s1414_s27 = smul.u32 (!%p1818_p8), 40, %s1950_s17  ;;  %s248_s15 = scalar_lea.sflag (!%p1818_p8), [#allocation3], %s1950_s17 }
  0x64   : > { %p2268_p7 = scmp.ne.s32.totalorder (!%p1818_p8), %s2262_s28, 0 }
  0x65   : > { %s1954_s7 = scalar_lea.vmem (!%p1818_p8), [#allocation2], %s1414_s27 }
  0x69   : > { %1684 = dma.done.wait (%p2268_p7), %s248_s15, 640  }
  0x6a   : > { %1686 = vsyncadd (%p2268_p7), %s248_s15, 4294966656  ;;  %p2269_p11 = scmp.ne.s32.totalorder %s2260_s26, 0 }
  0x6c   : > { %1688 = dma.done.wait (%p2269_p11), [#allocation6], 4608  }
  0x6d   : > { %1690 = vsyncadd (%p2269_p11), [#allocation6], 4294962688  ;;  %v1726_v0 = vmov 0   ;;  %v293_v1 = vld [vmem:[%s1954_s7 + $0x2] sm:$0x3]  ;;  %vm312_vm0 = vcmask 517120  }
  0x6e   : > { %794 = vmatprep.subr.bf16.mxu0 %v1726_v0  ;;  %v294_v2 = vld [vmem:[%s1954_s7 + $0x4] sm:$0x3]  ;;  %v295_v3 = vld [vmem:[%s1954_s7 + $0x6] sm:$0x3]  ;;  %v296_v4 = vld [vmem:[%s1954_s7 + $0x8] sm:$0x3] }
  0x6f   : > { %v297_v5 = vld [vmem:[%s1954_s7 + $0xa] sm:$0x3]  ;;  %v328_v6 = vsel %vm312_vm0, %v293_v1, 4286644096  ;;  %v341_v7 = vsel %vm312_vm0, %v294_v2, 4286644096 }
  0x70   : > { %v298_v8 = vld [vmem:[%s1954_s7 + $0xc] sm:$0x3]  ;;  %v330_v9 = vunpack.i.l.bf16 %v328_v6  ;;  %v331_v10 = vunpack.i.h.bf16 %v328_v6  ;;  %v343_v11 = vunpack.i.l.bf16 %v341_v7  ;;  %v344_v12 = vunpack.i.h.bf16 %v341_v7  ;;  %v299_v13 = vld [vmem:[%s1954_s7 + $0xe] sm:$0x3]  ;;  %v1510_v26 = vld [vmem:[#allocation5 + $0x8] sm:$0xff]   ;;  %s1727_s26 = smov 64  }
  0x71   : > { %v354_v14 = vsel %vm312_vm0, %v295_v3, 4286644096  ;;  %v367_v15 = vsel %vm312_vm0, %v296_v4, 4286644096  ;;  %v380_v16 = vsel %vm312_vm0, %v297_v5, 4286644096 }
  0x72   : > { %v332_v17 = vmax.f32 %v330_v9, %v331_v10  ;;  %v345_v18 = vmax.f32 %v343_v11, %v344_v12  ;;  %v356_v19 = vunpack.i.l.bf16 %v354_v14  ;;  %v357_v20 = vunpack.i.h.bf16 %v354_v14  ;;  %v1509_v21 = vld [vmem:[#allocation5] sm:$0xff]   ;;  %v1511_v44 = vld [vmem:[#allocation5 + $0x10] sm:$0xff]   ;;  %v1512_v2 = vld [vmem:[#allocation5 + $0x18] sm:$0xff]   ;;  %s1311_s25 = sshll.u32 %s1950_s17, 4  ;;  %s1360_s10 = sshll.u32 %s1709_s21, 8 }
  0x73   : > { %v369_v22 = vunpack.i.l.bf16 %v367_v15  ;;  %v370_v23 = vunpack.i.h.bf16 %v367_v15  ;;  %v382_v24 = vunpack.i.l.bf16 %v380_v16  ;;  %v383_v25 = vunpack.i.h.bf16 %v380_v16  ;;  %795 = vmatpush1.bf16.msra.mxu0 %v1509_v21  ;;  %v300_v31 = vld [vmem:[%s1954_s7 + $0x10] sm:$0x3]  ;;  %v301_v3 = vld [vmem:[%s1954_s7 + $0x12] sm:$0x3]  ;;  %v302_v4 = vld [vmem:[%s1954_s7 + $0x14] sm:$0x3]  ;;  %s2201_s27 = scalar_lea.hbm %s2255_s5, %s1360_s10 }
  0x74   : > { %v333_v27 = vrot.slane %v332_v17, 4  ;;  %v346_v28 = vrot.slane %v345_v18, 4  ;;  %v358_v29 = vmax.f32 %v356_v19, %v357_v20  ;;  %v393_v30 = vsel %vm312_vm0, %v298_v8, 4286644096  ;;  %796 = vmatprep.subr.bf16.mxu0 %v1726_v0  ;;  %s285_s11 = scalar_lea.vmem [#allocation8], %s1311_s25  ;;  %s1181_s15 = scalar_lea.sflag [#allocation4], %s1950_s17 }
  0x75   : > { %v371_v32 = vmax.f32 %v369_v22, %v370_v23  ;;  %v384_v33 = vmax.f32 %v382_v24, %v383_v25  ;;  %v395_v34 = vunpack.i.l.bf16 %v393_v30  ;;  %v396_v35 = vunpack.i.h.bf16 %v393_v30  ;;  %v1513_v22 = vld [vmem:[#allocation5 + $0x20] sm:$0xff]   ;;  %s1196_s13 = sshll.u32 %s285_s11, 4  ;;  %p2270_p12 = scmp.ne.s32.totalorder %s2266_s8, 0  ;;  %s2196_s13 = int_to_ptr.vmem [resolvable:$true] %s1196_s13 }
  0x76   : > { %v334_v36 = vmax.f32 %v332_v17, %v333_v27  ;;  %v347_v37 = vmax.f32 %v345_v18, %v346_v28  ;;  %v359_v38 = vrot.slane %v358_v29, 4  ;;  %v406_v39 = vsel %vm312_vm0, %v299_v13, 4286644096  ;;  %v303_v17 = vld [vmem:[%s1954_s7 + $0x16] sm:$0x3]  ;;  %s1731_s21 = smov [#allocation8]  }
  0x77   : > { %v372_v40 = vrot.slane %v371_v32, 4  ;;  %v385_v41 = vrot.slane %v384_v33, 4  ;;  %v397_v42 = vmax.f32 %v395_v34, %v396_v35  ;;  %v408_v43 = vunpack.i.l.bf16 %v406_v39  ;;  %797 = vmatpush1.bf16.msra.mxu0 %v1510_v26  ;;  %v304_v27 = vld [vmem:[%s1954_s7 + $0x18] sm:$0x3]  ;;  %v305_v28 = vld [vmem:[%s1954_s7 + $0x1a] sm:$0x3] }
  0x78   : > { %v335_v45 = vrot.slane %v334_v36, 2  ;;  %v348_v46 = vrot.slane %v347_v37, 2  ;;  %v360_v47 = vmax.f32 %v358_v29, %v359_v38  ;;  %v409_v48 = vunpack.i.h.bf16 %v406_v39  ;;  %798 = vmatprep.subr.bf16.mxu0 %v1726_v0 }
  0x79   : > { %v373_v49 = vmax.f32 %v371_v32, %v372_v40  ;;  %v386_v50 = vmax.f32 %v384_v33, %v385_v41  ;;  %v398_v51 = vrot.slane %v397_v42, 4  ;;  %v419_v52 = vsel %vm312_vm0, %v300_v31, 4286644096  ;;  %v1514_v41 = vld [vmem:[#allocation5 + $0x28] sm:$0xff]  }
  0x7a   : > { %v336_v53 = vmax.f32 %v334_v36, %v335_v45  ;;  %v349_v54 = vmax.f32 %v347_v37, %v348_v46  ;;  %v361_v55 = vrot.slane %v360_v47, 2  ;;  %v410_v56 = vmax.f32 %v408_v43, %v409_v48 }
  0x7b   : > { %v374_v57 = vrot.slane %v373_v49, 2  ;;  %v387_v58 = vrot.slane %v386_v50, 2  ;;  %v399_v59 = vmax.f32 %v397_v42, %v398_v51  ;;  %v421_v60 = vunpack.i.l.bf16 %v419_v52  ;;  %799 = vmatpush1.bf16.msra.mxu0 %v1511_v44 }
  0x7c   : > { %v337_v61 = vrot.slane %v336_v53, 1  ;;  %v350_v62 = vrot.slane %v349_v54, 1  ;;  %v362_v63 = vmax.f32 %v360_v47, %v361_v55  ;;  %v411_v1 = vrot.slane %v410_v56, 4  ;;  %800 = vmatprep.subr.bf16.mxu0 %v1726_v0  ;;  %v307_v55 = vld [vmem:[%s1954_s7 + $0x1e] sm:$0x3] }
  0x7d   : > { %v375_v5 = vmax.f32 %v373_v49, %v374_v57  ;;  %v388_v6 = vmax.f32 %v386_v50, %v387_v58  ;;  %v400_v7 = vrot.slane %v399_v59, 2  ;;  %v422_v8 = vunpack.i.h.bf16 %v419_v52  ;;  %v306_v50 = vld [vmem:[%s1954_s7 + $0x1c] sm:$0x3] }
  0x7e   : > { %v1986_v9 = vmax.f32 %v336_v53, %v337_v61  ;;  %v1988_v10 = vmax.f32 %v349_v54, %v350_v62  ;;  %v363_v11 = vrot.slane %v362_v63, 1  ;;  %v412_v12 = vmax.f32 %v410_v56, %v411_v1 }
  0x7f   : > { %v376_v13 = vrot.slane %v375_v5, 1  ;;  %v389_v14 = vrot.slane %v388_v6, 1  ;;  %v401_v15 = vmax.f32 %v399_v59, %v400_v7  ;;  %v423_v16 = vmax.f32 %v421_v60, %v422_v8  ;;  %801 = vmatpush1.bf16.msra.mxu0 %v1512_v2  ;;  %v1515_v60 = vld [vmem:[#allocation5 + $0x30] sm:$0xff]  }
  0x80   : > { %v339_v18 = vpack.i.bf16 %v1986_v9, %v1986_v9  ;;  %v352_v19 = vpack.i.bf16 %v1988_v10, %v1988_v10  ;;  %v1995_v20 = vmax.f32 %v362_v63, %v363_v11  ;;  %v413_v21 = vrot.slane %v412_v12, 2  ;;  %802 = vmatprep.subr.bf16.mxu0 %v1726_v0 }
  0x81   : > { %v1997_v23 = vmax.f32 %v375_v5, %v376_v13  ;;  %v1999_v24 = vmax.f32 %v388_v6, %v389_v14  ;;  %v402_v25 = vrot.slane %v401_v15, 1  ;;  %v424_v26 = vrot.slane %v423_v16, 4 }
  0x82   : > { %v365_v29 = vpack.i.bf16 %v1995_v20, %v1995_v20  ;;  %v414_v30 = vmax.f32 %v412_v12, %v413_v21  ;;  %v432_v31 = vsel %vm312_vm0, %v301_v3, 4286644096  ;;  %v445_v32 = vsel %vm312_vm0, %v302_v4, 4286644096  ;;  %v308_v12 = vld [vmem:[%s1954_s7 + $0x20] sm:$0x3] }
  0x83   : > { %v378_v33 = vpack.i.bf16 %v1997_v23, %v1997_v23  ;;  %v391_v34 = vpack.i.bf16 %v1999_v24, %v1999_v24  ;;  %v2012_v35 = vmax.f32 %v401_v15, %v402_v25  ;;  %v425_v36 = vmax.f32 %v423_v16, %v424_v26  ;;  %803 = vmatpush1.bf16.msra.mxu0 %v1513_v22 }
  0x84   : > { %v415_v37 = vrot.slane %v414_v30, 1  ;;  %v434_v38 = vunpack.i.l.bf16 %v432_v31  ;;  %v435_v39 = vunpack.i.h.bf16 %v432_v31  ;;  %v447_v40 = vunpack.i.l.bf16 %v445_v32  ;;  %804 = vmatprep.subr.bf16.mxu0 %v1726_v0 }
  0x85   : > { %v404_v42 = vpack.i.bf16 %v2012_v35, %v2012_v35  ;;  %v426_v43 = vrot.slane %v425_v36, 2  ;;  %v448_v44 = vunpack.i.h.bf16 %v445_v32  ;;  %v458_v45 = vsel %vm312_vm0, %v303_v17, 4286644096  ;;  %v1516_v17 = vld [vmem:[#allocation5 + $0x38] sm:$0xff]   ;;  %v1517_v32 = vld [vmem:[#allocation5 + $0x40] sm:$0xff]  }
  0x86   : > { %v2018_v46 = vmax.f32 %v414_v30, %v415_v37  ;;  %v436_v47 = vmax.f32 %v434_v38, %v435_v39  ;;  %v460_v48 = vunpack.i.l.bf16 %v458_v45  ;;  %v461_v49 = vunpack.i.h.bf16 %v458_v45 }
  0x87   : > { %v427_v51 = vmax.f32 %v425_v36, %v426_v43  ;;  %v449_v52 = vmax.f32 %v447_v40, %v448_v44  ;;  %v471_v53 = vsel %vm312_vm0, %v304_v27, 4286644096  ;;  %v484_v54 = vsel %vm312_vm0, %v305_v28, 4286644096  ;;  %805 = vmatpush1.bf16.msra.mxu0 %v1514_v41 }
  0x88   : > { %v417_v56 = vpack.i.bf16 %v2018_v46, %v2018_v46  ;;  %v437_v57 = vrot.slane %v436_v47, 4  ;;  %v462_v58 = vmax.f32 %v460_v48, %v461_v49  ;;  %v473_v59 = vunpack.i.l.bf16 %v471_v53  ;;  %806 = vmatprep.subr.bf16.mxu0 %v1726_v0  ;;  %v1520_v46 = vld [vmem:[#allocation5 + $0x58] sm:$0xff]  }
  0x89   : > { %v428_v61 = vrot.slane %v427_v51, 1  ;;  %v450_v62 = vrot.slane %v449_v52, 4  ;;  %v474_v63 = vunpack.i.h.bf16 %v471_v53  ;;  %v486_v1 = vunpack.i.l.bf16 %v484_v54 }
  0x8a   : > { %v438_v2 = vmax.f32 %v436_v47, %v437_v57  ;;  %v463_v3 = vrot.slane %v462_v58, 4  ;;  %v487_v4 = vunpack.i.h.bf16 %v484_v54  ;;  %v497_v5 = vsel %vm312_vm0, %v306_v50, 4286644096 }
  0x8b   : > { %v2028_v6 = vmax.f32 %v427_v51, %v428_v61  ;;  %v451_v7 = vmax.f32 %v449_v52, %v450_v62  ;;  %v475_v8 = vmax.f32 %v473_v59, %v474_v63  ;;  %v499_v11 = vunpack.i.l.bf16 %v497_v5  ;;  %807 = vmatpush1.bf16.msra.mxu0 %v1515_v60  ;;  %v1518_v63 = vld [vmem:[#allocation5 + $0x48] sm:$0xff]  }
  0x8c   : > { %v439_v13 = vrot.slane %v438_v2, 2  ;;  %v464_v14 = vmax.f32 %v462_v58, %v463_v3  ;;  %v488_v15 = vmax.f32 %v486_v1, %v487_v4  ;;  %v500_v16 = vunpack.i.h.bf16 %v497_v5  ;;  %808 = vmatprep.subr.bf16.mxu0 %v1726_v0 }
  0x8d   : > { %v430_v21 = vpack.i.bf16 %v2028_v6, %v2028_v6  ;;  %v452_v22 = vrot.slane %v451_v7, 2  ;;  %v476_v25 = vrot.slane %v475_v8, 4  ;;  %v510_v26 = vsel %vm312_vm0, %v307_v55, 4286644096  ;;  %v309_v6 = vld [vmem:[%s1954_s7 + $0x22] sm:$0x3] }
  0x8e   : > { %v440_v27 = vmax.f32 %v438_v2, %v439_v13  ;;  %v465_v28 = vrot.slane %v464_v14, 2  ;;  %v489_v30 = vrot.slane %v488_v15, 4  ;;  %v501_v31 = vmax.f32 %v499_v11, %v500_v16 }
  0x8f   : > { %v453_v36 = vmax.f32 %v451_v7, %v452_v22  ;;  %v477_v37 = vmax.f32 %v475_v8, %v476_v25  ;;  %v512_v38 = vunpack.i.l.bf16 %v510_v26  ;;  %v513_v39 = vunpack.i.h.bf16 %v510_v26  ;;  %809 = vmatpush1.bf16.msra.mxu0 %v1516_v17 }
  0x90   : > { %v441_v40 = vrot.slane %v440_v27, 1  ;;  %v466_v41 = vmax.f32 %v464_v14, %v465_v28  ;;  %v490_v43 = vmax.f32 %v488_v15, %v489_v30  ;;  %v502_v44 = vrot.slane %v501_v31, 4  ;;  %810 = vmatprep.subr.bf16.mxu0 %v1726_v0 }
  0x91   : > { %v454_v45 = vrot.slane %v453_v36, 1  ;;  %v478_v47 = vrot.slane %v477_v37, 2  ;;  %v514_v48 = vmax.f32 %v512_v38, %v513_v39  ;;  %v523_v49 = vsel %vm312_vm0, %v308_v12, 4286644096 }
  0x92   : > { %v442_v50 = vmax.f32 %v440_v27, %v441_v40  ;;  %v467_v51 = vrot.slane %v466_v41, 1  ;;  %v491_v52 = vrot.slane %v490_v43, 2  ;;  %v503_v53 = vmax.f32 %v501_v31, %v502_v44 }
  0x93   : > { %v455_v54 = vmax.f32 %v453_v36, %v454_v45  ;;  %v479_v55 = vmax.f32 %v477_v37, %v478_v47  ;;  %v515_v57 = vrot.slane %v514_v48, 4  ;;  %v525_v58 = vunpack.i.l.bf16 %v523_v49  ;;  %811 = vmatpush1.bf16.msra.mxu0 %v1517_v32 }
  0x94   : > { %vm610_vm1 = vcmask 1041409   ;;  %v443_v59 = vpack.i.bf16 %v442_v50, %v442_v50  ;;  %v468_v60 = vmax.f32 %v466_v41, %v467_v51  ;;  %v492_v61 = vmax.f32 %v490_v43, %v491_v52  ;;  %812 = vmatprep.subr.bf16.mxu0 %v1726_v0 }
  0x95   : > { %v504_v62 = vrot.slane %v503_v53, 2  ;;  %vm612_vm2 = vcmask 1042434   ;;  %v456_v1 = vpack.i.bf16 %v455_v54, %v455_v54  ;;  %v480_v2 = vrot.slane %v479_v55, 1 }
  0x96   : > { %v516_v3 = vmax.f32 %v514_v48, %v515_v57  ;;  %v526_v4 = vunpack.i.h.bf16 %v523_v49  ;;  %vm614_vm3 = vcmask 1043459   ;;  %v469_v5 = vpack.i.bf16 %v468_v60, %v468_v60 }
  0x97   : > { %v493_v7 = vrot.slane %v492_v61, 1  ;;  %v505_v8 = vmax.f32 %v503_v53, %v504_v62  ;;  %v2041_v11 = vunpack.c.l.b16 %v339_v18  ;;  %vm616_vm4 = vcmask 1044484   ;;  %813 = vmatpush1.bf16.msra.mxu0 %v1518_v63  ;;  %v1519_v18 = vld [vmem:[#allocation5 + $0x50] sm:$0xff]  }
  0x98   : > { %v481_v12 = vmax.f32 %v479_v55, %v480_v2  ;;  %v517_v13 = vrot.slane %v516_v3, 2  ;;  %v527_v14 = vmax.f32 %v525_v58, %v526_v4  ;;  %v2046_v15 = vunpack.c.l.b16 %v352_v19  ;;  %814 = vmatprep.subr.bf16.mxu0 %v1726_v0 }
  0x99   : > { %vm618_vm5 = vcmask 1045509   ;;  %v494_v16 = vmax.f32 %v492_v61, %v493_v7  ;;  %v506_v17 = vrot.slane %v505_v8, 1  ;;  %v2051_v22 = vunpack.c.l.b16 %v365_v29 }
  0x9a   : > { %v2056_v9 = vunpack.c.l.b16 %v378_v33  ;;  %v482_v25 = vpack.i.bf16 %v481_v12, %v481_v12  ;;  %v518_v26 = vmax.f32 %v516_v3, %v517_v13  ;;  %v528_v10 = vrot.slane %v527_v14, 4  ;;  %v292_v3 = vld [vmem:[%s1954_s7] sm:$0x3] }
  0x9b   : > { %v2061_v19 = vunpack.c.l.b16 %v391_v34  ;;  %vm620_vm6 = vcmask 1046534   ;;  %v495_v20 = vpack.i.bf16 %v494_v16, %v494_v16  ;;  %v507_v29 = vmax.f32 %v505_v8, %v506_v17  ;;  %815 = vmatpush1.bf16.msra.mxu0 %v1519_v18 }
  0x9c   : > { %v2067_v23 = vunpack.c.l.b16 %v404_v42  ;;  %v2072_v33 = vunpack.c.l.b16 %v417_v56  ;;  %v519_v24 = vrot.slane %v518_v26, 1  ;;  %v529_v34 = vmax.f32 %v527_v14, %v528_v10  ;;  %816 = vmatprep.subr.bf16.mxu0 %v1726_v0 }
  0x9d   : > { %v2077_v27 = vunpack.c.l.b16 %v430_v21  ;;  %v2079_v28 = vunpack.c.l.b16 %v443_v59  ;;  %v508_v30 = vpack.i.bf16 %v507_v29, %v507_v29  ;;  %v602_v35 = vunpack.c.l.b16 %v456_v1  ;;  %v310_v21 = vld [vmem:[%s1954_s7 + $0x24] sm:$0x3] }
  0x9e   : > { %v603_v42 = vunpack.c.l.b16 %v469_v5  ;;  %v2081_v31 = vunpack.c.l.b16 %v482_v25  ;;  %v520_v32 = vmax.f32 %v518_v26, %v519_v24  ;;  %v530_v56 = vrot.slane %v529_v34, 2 }
  0x9f   : > { %v2083_v36 = vunpack.c.l.b16 %v495_v20  ;;  %v624_v37 = vsel %vm610_vm1, %v2079_v28, %v2077_v27  ;;  %v606_v38 = vunpack.c.l.b16 %v508_v30  ;;  %v636_v40 = vsel %vm610_vm1, %v2046_v15, %v2041_v11  ;;  %817 = vmatpush1.bf16.msra.mxu0 %v1520_v46  ;;  %v311_v30 = vld [vmem:[%s1954_s7 + $0x26] sm:$0x3]  ;;  %s1631_s7 = scalar_lea.vmem %s2196_s13, 256 }
  0xa0   : > { %v625_v39 = vsel %vm612_vm2, %v602_v35, %v624_v37  ;;  %v643_v41 = vsel %vm610_vm1, %v602_v35, %v2079_v28  ;;  %v521_v43 = vpack.i.bf16 %v520_v32, %v520_v32  ;;  %v531_v44 = vmax.f32 %v529_v34, %v530_v56  ;;  %p1632_p8 = scmp.ne.s32.totalorder %s2196_s13, %s1631_s7 }
  0xa1   : > { %v626_v45 = vsel %vm614_vm3, %v603_v42, %v625_v39  ;;  %v637_v47 = vsel %vm612_vm2, %v2051_v22, %v636_v40  ;;  %v644_v48 = vsel %vm612_vm2, %v603_v42, %v643_v41  ;;  %v536_v49 = vsel %vm312_vm0, %v309_v6, 4286644096 }
  0xa2   : > { %v638_v0 = vsel %vm614_vm3, %v2056_v9, %v637_v47  ;;  %v549_v50 = vsel %vm312_vm0, %v310_v21, 4286644096  ;;  %v532_v51 = vrot.slane %v531_v44, 1  ;;  %v607_v52 = vunpack.c.l.b16 %v521_v43  ;;  %p1633_p1 = pnand %p1632_p8, %p2270_p12 }
  0xa3   : > { %v639_v53 = vsel %vm616_vm4, %v2061_v19, %v638_v0  ;;  %v645_v54 = vsel %vm614_vm3, %v2081_v31, %v644_v48  ;;  %v538_v58 = vunpack.i.l.bf16 %v536_v49  ;;  %v539_v59 = vunpack.i.h.bf16 %v536_v49 }
  0xa4   : > { %v640_v55 = vsel %vm618_vm5, %v2067_v23, %v639_v53  ;;  %v646_v57 = vsel %vm616_vm4, %v2083_v36, %v645_v54  ;;  %v533_v60 = vmax.f32 %v531_v44, %v532_v51  ;;  %v551_v62 = vunpack.i.l.bf16 %v549_v50  ;;  %v1521_v53 = vld [vmem:[#allocation7 + $0x40] sm:$0xff]   ;;  %p1634_p10 = pneg %p1633_p1 }
  0xa5   : > { %v647_v61 = vsel %vm618_vm5, %v606_v38, %v646_v57  ;;  %vm622_vm7 = vcmask 1047559   ;;  %v641_v63 = vsel %vm620_vm6, %v2072_v33, %v640_v55  ;;  %v540_v1 = vmax.f32 %v538_v58, %v539_v59  ;;  %v1522_v54 = vld [vmem:[#allocation7] sm:$0xff]   ;;  %v1523_v55 = vld [vmem:[#allocation7 + $0x48] sm:$0xff]   ;;  %1361 = vmatprep.subr.bf16.mxu1 %v1521_v53 }
  0xa6   : > { %v552_v2 = vunpack.i.h.bf16 %v549_v50  ;;  %v534_v4 = vpack.i.bf16 %v533_v60, %v533_v60  ;;  %v648_v5 = vsel %vm620_vm6, %v607_v52, %v647_v61  ;;  %v659_v7 = vsel %vm610_vm1, %v2051_v22, %v2046_v15  ;;  %1362 = vmatpush3.bf16.msra.mxu1 %v1522_v54  ;;  %v1312_v54 = vld [vmem:[%s2253_s3] ss:$0 sm:$0xff] }
  0xa7   : > { %v666_v8 = vsel %vm610_vm1, %v603_v42, %v602_v35  ;;  %v541_v12 = vrot.slane %v540_v1, 4  ;;  %v660_v14 = vsel %vm612_vm2, %v2056_v9, %v659_v7  ;;  %v642_v18 = vsel %vm622_vm7, %v2077_v27, %v641_v63  ;;  %v1524_v63 = vld [vmem:[#allocation7 + $0x8] sm:$0xff]   ;;  %1363 = vmatprep.subr.bf16.mxu1 %v1523_v55 }
  0xa8   : > { %v553_v13 = vmax.f32 %v551_v62, %v552_v2  ;;  %v667_v16 = vsel %vm612_vm2, %v2081_v31, %v666_v8  ;;  %v608_v17 = vunpack.c.l.b16 %v534_v4  ;;  %v315_v25 = vsel %vm312_vm0, %v292_v3, 4286644096  ;;  %v1525_v4 = vld [vmem:[#allocation7 + $0x50] sm:$0xff]  }
  0xa9   : > { %v542_v26 = vmax.f32 %v540_v1, %v541_v12  ;;  %v661_v20 = vsel %vm614_vm3, %v2061_v19, %v660_v14  ;;  %v668_v29 = vsel %vm614_vm3, %v2083_v36, %v667_v16  ;;  %v317_v34 = vunpack.i.l.bf16 %v315_v25  ;;  %v1526_v16 = vld [vmem:[#allocation7 + $0x10] sm:$0xff]  }
  0xaa   : > { %v554_v10 = vrot.slane %v553_v13, 4  ;;  %v649_v24 = vsel %vm622_vm7, %v608_v17, %v648_v5  ;;  %v662_v32 = vsel %vm616_vm4, %v2067_v23, %v661_v20  ;;  %v669_v56 = vsel %vm616_vm4, %v606_v38, %v668_v29  ;;  %1364 = vmatpush3.bf16.msra.mxu1 %v1524_v63 }
  0xab   : > { %v651_v35 = vpack.c.b16 %v649_v24, %v642_v18  ;;  %v543_v42 = vrot.slane %v542_v26, 2  ;;  %v318_v37 = vunpack.i.h.bf16 %v315_v25  ;;  %v627_v6 = vsel %vm616_vm4, %v2081_v31, %v626_v45  ;;  %1365 = vmatprep.subr.bf16.mxu1 %v1525_v4 }
  0xac   : > { %v555_v46 = vmax.f32 %v553_v13, %v554_v10  ;;  %v628_v40 = vsel %vm618_vm5, %v2083_v36, %v627_v6  ;;  %v562_v41 = vsel %vm312_vm0, %v311_v30, 4286644096  ;;  %v663_v31 = vsel %vm618_vm5, %v2072_v33, %v662_v32 }
  0xad   : > { %653 = vrot.lane.b32.xlu0 %v651_v35, %s1727_s26  ;;  %v544_v21 = vmax.f32 %v542_v26, %v543_v42  ;;  %v319_v43 = vmax.f32 %v317_v34, %v318_v37  ;;  %v629_v44 = vsel %vm620_vm6, %v606_v38, %v628_v40  ;;  %v564_v47 = vunpack.i.l.bf16 %v562_v41 }
  0xae   : > { %v556_v39 = vrot.slane %v555_v46, 2  ;;  %v565_v0 = vunpack.i.h.bf16 %v562_v41  ;;  %v630_v45 = vsel %vm622_vm7, %v607_v52, %v629_v44  ;;  %v670_v58 = vsel %vm618_vm5, %v607_v52, %v669_v56  ;;  %1366 = vmatpush3.bf16.msra.mxu1 %v1526_v16  ;;  %v1528_v44 = vld [vmem:[#allocation7 + $0x18] sm:$0xff]  }
  0xaf   : > { %v545_v48 = vrot.slane %v544_v21, 1  ;;  %v320_v50 = vrot.slane %v319_v43, 4  ;;  %v664_v38 = vsel %vm620_vm6, %v2077_v27, %v663_v31  ;;  %v671_v1 = vsel %vm620_vm6, %v608_v17, %v670_v58  ;;  %v1535_v31 = vld [vmem:[#allocation7 + $0x78] sm:$0xff]  }
  0xb0   : > { %v557_v49 = vmax.f32 %v555_v46, %v556_v39  ;;  %v566_v51 = vmax.f32 %v564_v47, %v565_v0  ;;  %v665_v52 = vsel %vm622_vm7, %v2079_v28, %v664_v38  ;;  %vm676_vm8 = vcmask 523264   ;;  %v1530_v47 = vld [vmem:[#allocation7 + $0x20] sm:$0xff]   ;;  %v1532_v0 = vld [vmem:[#allocation7 + $0x28] sm:$0xff]  }
  0xb1   : > { %v546_v36 = vmax.f32 %v544_v21, %v545_v48  ;;  %v321_v59 = vmax.f32 %v319_v43, %v320_v50  ;;  %v1533_v48 = vld [vmem:[#allocation7 + $0x70] sm:$0xff]   ;;  %v1728_v50 = vmov 0.0   ;;  %vm890_vm11 = vcmask 1046528  }
  0xb2   : > { %v558_v57 = vrot.slane %v557_v49, 1  ;;  %v567_v60 = vrot.slane %v566_v51, 4  ;;  %vm874_vm12 = vsmask.f32 7424  ;;  %vm1729_vm13 = vmmov 1  }
  0xb3   : > { %v547_v61 = vpack.i.bf16 %v546_v36, %v546_v36  ;;  %v322_v2 = vrot.slane %v321_v59, 2  ;;  %vm1730_vm15 = vmmov 0  }
  0xb4   : > { %v559_v62 = vmax.f32 %v557_v49, %v558_v57  ;;  %v568_v3 = vmax.f32 %v566_v51, %v567_v60  ;;  %v1534_v49 = vld [vmem:[#allocation7 + $0x30] sm:$0xff]   ;;  %v846_v51 = vlaneseq }
  0xb5   : > { %v609_v7 = vunpack.c.l.b16 %v547_v61  ;;  %v323_v8 = vmax.f32 %v321_v59, %v322_v2 }
  0xb6   : > { %v560_v5 = vpack.i.bf16 %v559_v62, %v559_v62  ;;  %v569_v27 = vrot.slane %v568_v3, 2  ;;  %v847_v53 = vshrl.u32 %v846_v51, 7 }
  0xb7   : > { %v672_v13 = vsel %vm622_vm7, %v609_v7, %v671_v1  ;;  %v631_v14 = vsel %vm610_vm1, %v609_v7, %v608_v17  ;;  %v324_v25 = vrot.slane %v323_v8, 1 }
  0xb8   : > { %v635_v12 = vunpack.c.l.b16 %v560_v5  ;;  %v674_v18 = vpack.c.b16 %v672_v13, %v665_v52  ;;  %v570_v26 = vmax.f32 %v568_v3, %v569_v27  ;;  %v851_v55 = vadd.s32 4294967295, %v847_v53 }
  0xb9   : > { %v325_v28 = vmax.f32 %v323_v8, %v324_v25  ;;  %v849_v3 = vadd.s32 16, %v847_v53 }
  0xba   : > { %v650_v10 = vsel %vm610_vm1, %v635_v12, %v609_v7  ;;  %1325 = vmatprep.mubr.msk.bf16.mxu0 %vm676_vm8, %v674_v18  ;;  %v571_v29 = vrot.slane %v570_v26, 1  ;;  %vm854_vm9 = vcmp.ge.s32.totalorder %v851_v55, 0 }
  0xbb   : > { %v652_v20 = vpack.c.b16 %v650_v10, %v650_v10  ;;  %v326_v24 = vpack.i.bf16 %v325_v28, %v325_v28  ;;  %v853_v4 = vadd.s32 4294967295, %v849_v3  ;;  %vm1352_vm14 = vmpackc.low %vm1729_vm13, %vm854_vm9 }
  0xbc   : > { %v572_v34 = vmax.f32 %v570_v26, %v571_v29 }
  0xbd   : > { %655 = vrot.lane.b32.xlu0 %v652_v20, %s1727_s26  ;;  %v592_v30 = vunpack.c.l.b16 %v326_v24  ;;  %vm859_vm10 = vcmp.lt.s32.totalorder %v853_v4, 16  ;;  %s1635_s26 = sshll.u32 %s1731_s21, 4  ;;  %s1636_s26 = int_to_ptr.vmem [resolvable:$false] %s1635_s26 }
  0xbe   : > { %v573_v17 = vpack.i.bf16 %v572_v34, %v572_v34  ;;  %v1537_v34 = vld [vmem:[#allocation7 + $0x80] sm:$0xff]   ;;  %s1637_s28 = scalar_lea.vmem %s1636_s26, 512  ;;  %p1638_p3 = scmp.lt.s32.totalorder %s2196_s13, %s1636_s26 }
  0xbf   : > { %v611_v35 = vsel %vm610_vm1, %v2041_v11, %v592_v30  ;;  %p1639_p5 = scmp.lt.s32.totalorder %s1637_s28, %s1631_s7 }
  0xc0   : > { %v658_v42 = vunpack.c.l.b16 %v573_v17  ;;  %v613_v46 = vsel %vm612_vm2, %v2046_v15, %v611_v35  ;;  %v1538_v17 = vld [vmem:[#allocation7 + $0x88] sm:$0xff]   ;;  %v1539_v35 = vld [vmem:[#allocation7 + $0x90] sm:$0xff]  }
  0xc1   : > { %v615_v32 = vsel %vm614_vm3, %v2051_v22, %v613_v46  ;;  %v633_v22 = vpack.c.b16 %v631_v14, %v631_v14  ;;  %v1541_v46 = vld [vmem:[#allocation7 + $0xa0] sm:$0xff]   ;;  %p1640_p9 = por %p1639_p5, %p1638_p3 }
  0xc2   : > { %v673_v56 = vsel %vm610_vm1, %v658_v42, %v635_v12  ;;  %v617_v37 = vsel %vm616_vm4, %v2056_v9, %v615_v32  ;;  %v1540_v42 = vld [vmem:[#allocation7 + $0x98] sm:$0xff]   ;;  %v1542_v32 = vld [vmem:[#allocation7 + $0xa8] sm:$0xff]  }
  0xc3   : > { %v619_v6 = vsel %vm618_vm5, %v2061_v19, %v617_v37  ;;  %v675_v40 = vpack.c.b16 %v673_v56, %v673_v56  ;;  %v1527_v19 = vld [vmem:[#allocation7 + $0x58] sm:$0xff]   ;;  %v1543_v56 = vld [vmem:[#allocation7 + $0xb0] sm:$0xff]   ;;  %p1641_p2 = pnand %p1640_p9, %p1634_p10 }
  0xc4   : > { %v621_v21 = vsel %vm620_vm6, %v2067_v23, %v619_v6  ;;  %1367 = vmatprep.subr.bf16.mxu1 %v1527_v19  ;;  %v1529_v23 = vld [vmem:[#allocation7 + $0x60] sm:$0xff]   ;;  %v1544_v37 = vld [vmem:[#allocation7 + $0xb8] sm:$0xff]  }
  0xc5   : > { %v623_v11 = vsel %vm622_vm7, %v2072_v33, %v621_v21  ;;  %1368 = vmatpush3.bf16.msra.mxu1 %v1528_v44  ;;  %v1531_v33 = vld [vmem:[#allocation7 + $0x68] sm:$0xff]  }
  0xc6   : > { %v632_v39 = vpack.c.b16 %v630_v45, %v623_v11  ;;  %1369 = vmatprep.subr.bf16.mxu1 %v1529_v23  ;;  %v1536_v45 = vld [vmem:[#allocation7 + $0x38] sm:$0xff]  }
  0xc9   : > { %1370 = vmatpush3.bf16.msra.mxu1 %v1530_v47 }
  0xca   : > { %1371 = vmatprep.subr.bf16.mxu1 %v1531_v33 }
  0xcd   : > { %1372 = vmatpush3.bf16.msra.mxu1 %v1532_v0 }
  0xce   : > { %1373 = vmatprep.subr.bf16.mxu1 %v1533_v48 }
  0xd1   : > { %1374 = vmatpush3.bf16.msra.mxu1 %v1534_v49 }
  0xd2   : > { %1375 = vmatprep.subr.bf16.mxu1 %v1535_v31 }
  0xd5   : > { %1376 = vmatpush3.bf16.msra.mxu1 %v1536_v45 }
  0xd6   : > { %1392 = vmatprep.subr.bf16.mxu1 %v1728_v50 }
 0x11f   : > { %v654_v15 = vpop.permute.xlu0 %653 }
 0x120   : > { %v679_v41 = vsel %vm676_vm8, %v632_v39, %v654_v15 }
 0x121   : > { %827 = vmatmul.mubr.bf16.vlgmr.msra.gmra.mrb[0].mxu0 %v679_v41  ;;  %v1327_v41 = vld [vmem:[%s2254_s4] ss:$0 sm:$0xff] }
 0x122   : > { %1326 = vmatprep.mubr.msk.bf16.mxu0 %vm676_vm8, %v675_v40 }
 0x12f   : > { %v656_v43 = vpop.permute.xlu0 %655 }
 0x130   : > { %v683_v9 = vsel %vm676_vm8, %v633_v22, %v656_v43 }
 0x131   : > { %835 = vmatmul.mubr.bf16.gmra.mrb[4].mxu0 %v683_v9 }
 0x1f4   : > { %v828_v36 = vpop.f32.mrb[0].mxu0 }
 0x1f5   : > { %v829_v57 = vadd.f32 %v1312_v54, %v828_v36  ;;  %v830_v58 = vpop.f32.mrb[1].mxu0 }
 0x1f6   : > { %v831_v38 = vpop.f32.mrb[2].mxu0 }
 0x1f7   : > { %v842_v59 = vmax.f32 %v829_v57, 0.0  ;;  %v832_v60 = vadd.f32 %v1312_v54, %v831_v38  ;;  %v833_v61 = vpop.f32.mrb[3].mxu0 }
 0x1f9   : > { %v869_v62 = vsel %vm854_vm9, %v842_v59, 0.0  ;;  %v843_v63 = vmax.f32 %v832_v60, 0.0 }
 0x1fb   : > { %v872_v1 = vpack.c.bf16 %v843_v63, %v869_v62  ;;  %v1353_v2 = vpack.c.bf16 %v843_v63, %v842_v59 }
 0x1fd   : > { %v878_v27 = vshll.u32 %v872_v1, 16  ;;  %v891_v25 = vrot.slane %v872_v1, 1  ;;  %v876_v10 = vshrl.u32 %v872_v1, 16 }
 0x1ff   : > { %v880_v18 = vrot.slane %v878_v27, 1 }
 0x201   : > { %v881_v28 = vor.u32 %v880_v18, %v876_v10 }
 0x204   : > { %v836_v5 = vpop.f32.mrb[4].mxu0 }
 0x205   : > { %v837_v7 = vadd.f32 %v1312_v54, %v836_v5  ;;  %v838_v52 = vpop.f32.mrb[5].mxu0 }
 0x206   : > { %v839_v8 = vpop.f32.mrb[6].mxu0 }
 0x207   : > { %v844_v12 = vmax.f32 %v837_v7, 0.0  ;;  %v840_v13 = vpop.f32.mrb[7].mxu0 }
 0x209   : > { %v871_v14 = vsel %vm859_vm10, %v844_v12, 0.0 }
 0x20a   : > { %v873_v16 = vpack.c.bf16 %v871_v14, %v871_v14 }
 0x20c   : > { %v892_v26 = vrot.slane %v873_v16, 1  ;;  %v883_v20 = vshll.u32 %v873_v16, 16 }
 0x20e   : > { %v885_v29 = vrot.slane %v883_v20, 1  ;;  %v893_v24 = vsel %vm890_vm11, %v891_v25, %v892_v26 }
 0x210   : > { %v886_v30 = vsel %vm874_vm12, %v881_v28, %v885_v29 }
 0x211   : > { %1126 = vmatprep.mubr.bf16.mxu1 %v886_v30 }
 0x212   : > { %1354 = vmatmul.mubr.msk.bf16.vlgmr.msra.gmra.mrb[0].mxu1 %vm1352_vm14, %v1353_v2 }
 0x213   : > { %1393 = vmatpush3.bf16.msra.mxu1 %v1537_v34  ;;  %1408 = vmatprep.mubr.msk.bf16.mxu1 %vm1730_vm15, %v1728_v50 }
 0x214   : > { %1394 = vmatprep.subr.bf16.mxu1 %v1728_v50 }
 0x217   : > { %1395 = vmatpush3.bf16.msra.mxu1 %v1538_v17 }
 0x218   : > { %1396 = vmatprep.subr.bf16.mxu1 %v1728_v50 }
 0x21b   : > { %1397 = vmatpush3.bf16.msra.mxu1 %v1539_v35 }
 0x21c   : > { %1398 = vmatprep.subr.bf16.mxu1 %v1728_v50 }
 0x21f   : > { %1399 = vmatpush3.bf16.msra.mxu1 %v1540_v42 }
 0x220   : > { %1400 = vmatprep.subr.bf16.mxu1 %v1728_v50 }
 0x223   : > { %1401 = vmatpush3.bf16.msra.mxu1 %v1541_v46 }
 0x224   : > { %1402 = vmatprep.subr.bf16.mxu1 %v1728_v50 }
 0x227   : > { %1403 = vmatpush3.bf16.msra.mxu1 %v1542_v32 }
 0x228   : > { %1404 = vmatprep.subr.bf16.mxu1 %v1728_v50 }
 0x22b   : > { %1405 = vmatpush3.bf16.msra.mxu1 %v1543_v56 }
 0x22c   : > { %1406 = vmatprep.subr.bf16.mxu1 %v1728_v50 }
 0x22f   : > { %1407 = vmatpush3.bf16.msra.mxu1 %v1544_v37 }
 0x232   : > { %1409 = vmatmul.mubr.bf16.vlgmr.msra.gmra.mrb[4].mxu1 %v893_v24 }
 0x2e5   : > { %v1377_v6 = vpop.f32.mrb[0].mxu1 }
 0x2e6   : > { %v1378_v21 = vpop.f32.mrb[1].mxu1 }
 0x2e7   : > { %v1379_v11 = vadd.f32 %v1378_v21, %v1377_v6  ;;  %v1380_v39 = vpop.f32.mrb[2].mxu1 }
 0x2e8   : > { %v1381_v40 = vpop.f32.mrb[3].mxu1 }
 0x2e9   : > { %v1382_v15 = vadd.f32 %v1381_v40, %v1380_v39  ;;  %v1129_v22 = vadd.f32 %v1379_v11, %v1327_v41 }
 0x2eb   : > { %v1132_v44 = vadd.f32 %v1382_v15, %v1327_v41 }
 0x305   : > { %v1169_v43 = vpop.f32.mrb[4].mxu1 }
 0x306   : > { %v1170_v9 = vadd.f32 %v1169_v43, %v1129_v22  ;;  %v1410_v19 = vpop.f32.mrb[5].mxu1 }
 0x307   : > { %v1172_v23 = vpop.f32.mrb[6].mxu1 }
 0x308   : > { %v1176_v47 = vmax.f32 %v1170_v9, 0.0  ;;  %v1173_v33 = vadd.f32 %v1172_v23, %v1132_v44  ;;  %v1411_v0 = vpop.f32.mrb[7].mxu1 }
 0x30a   : > { %1178 = vst [vmem:[%s285_s11] sm:$0xff] %v1176_v47  ;;  %v1177_v48 = vmax.f32 %v1173_v33, 0.0 }
 0x30c   : > { %1179 = vst [vmem:[%s285_s11 + $0x8] sm:$0xff] %v1177_v48 }
 0x30d   : > { %1644 = shalt.err (!%p1641_p2)
}
 0x30e   : > { %s1645_s30 = scalar_lea.hbm %s2201_s27, 256  ;;  %s1649_s9 = scalar_lea.hbm %s2255_s5, 512 }
 0x30f   : > { %p1646_p0 = scmp.ne.s32.totalorder %s2201_s27, %s1645_s30  ;;  %p1650_p6 = scmp.lt.u32.totalorder %s2201_s27, %s2255_s5 }
 0x310   : > { %p1651_p7 = scmp.lt.u32.totalorder %s1649_s9, %s1645_s30  ;;  %p1653_p8 = scmp.lt.u32.totalorder %s1645_s30, %s2201_s27 }
 0x311   : > { %p1647_p4 = pnand %p1646_p0, %p2270_p12 }
 0x312   : > { %p1652_p11 = por %p1651_p7, %p1650_p6 }
 0x313   : > { %p1648_p13 = pneg %p1647_p4 }
 0x314   : > { %p1654_p1 = por %p1653_p8, %p1652_p11 }
 0x316   : > { %p1655_p10 = pnand %p1654_p1, %p1648_p13 }
 0x318   : > { %1658 = shalt.err (!%p1655_p10)
}
 0x319   : > { %s1732_s14 = smov 128   ;;  %s1733_s16 = smov 8  }
 0x31a   : > { %1425 = dma.vmem_to_hbm [thread:$0]  (%p2270_p12), %s2196_s13, 256, %s2201_s27, %s1181_s15, %s1732_s14, %s1732_s14, %s1733_s16  }
 0x31b PF: > { %s1211_s7 = sand.u32 1, %s1697_s18   ;;  %p2271_p3 = scmp.ne.s32.totalorder %s2263_s29, 0 }
 0x31c   : > { %p2272_p5 = scmp.ge.s32.totalorder %s1717_s23, 2  ;;  %s1212_s21 = scalar_lea.sflag [#allocation4], %s1211_s7 }
 0x31e   : > { %p1439_p9 = pnand %p2272_p5, %p2271_p3 }
 0x320   : > { %1692 = dma.done.wait (!%p1439_p9), %s1212_s21, 256  }
 0x321   : > { %1694 = vsyncadd (!%p1439_p9), %s1212_s21, 4294967040  ;;  %s22_s23 = sadd.s32 1, %s1717_s23   ;;  %s2273_s18 = smov %s1701_s19 }
 0x322   : > { %p19_p2 = scmp.ge.s32.totalorder %s22_s23, 4   ;;  %s2274_s19 = smov %s1705_s20 }
 0x323   : > { %s2275_s20 = smov %s1909_s6  ;;  %s2276_s21 = smov %s1713_s22 }
 0x324   : > { %s2277_s22 = smov %s2279_s12  ;;  %21 = sbr.rel (!%p19_p2) target bundleno = 7 (0x7), region = 94 }
 0x32b   :  { %1217 = vsyncpa [#allocation3], 1 }
 0x32c   :  { %1219 = vsyncpa [#allocation3 + $0x1], 1 }
 0x32d   :  { %1220 = vsyncpa [#allocation6], 1 }
 0x32e   :  { %1221 = vsyncpa [#allocation4], 1 }
 0x32f   :  { %1223 = vsyncpa [#allocation4 + $0x1], 1 }

</bundles_post_ra>
